<compile_context>
chip_gen: v7x
topology: tpu7x:2x2x1
jax: 0.10.0
libtpu: 0.0.40
codegen_flags: <defaults>
</compile_context>

<pallas_src>
import functools

import jax
import jax.numpy as jnp
from jax.experimental import pallas as pl
from jax.experimental.pallas import tpu as pltpu

LATENT_SIZE = 128
FEATURE_DIM = 256      # stand-in for config.DATASET.FEATURE_DIM
NUM_SEGMENTS = 8       # stand-in for config.DATASET.NUM_SEGMENTS


# --------------------------------------------------------------------------- kernel

def _cdecoder_kernel(z_ref, att_ref,
                     w1z_ref, w1a_ref, b1_ref,
                     w2_ref, b2_ref,
                     w3_ref, b3_ref,
                     out_ref):
    # bf16 operands for the MXU, f32 accumulation everywhere.
    # (astype is a no-op when the producer already hands us bf16 z.)
    z = z_ref[...].astype(jnp.bfloat16)          # (TM, L)
    att = att_ref[...].astype(jnp.float32)       # (TM, 1)

    # fc1 on cat([z, att]):  z @ W1z  +  att * w1a  +  b1
    h = jnp.dot(z, w1z_ref[...], preferred_element_type=jnp.float32)
    h = h + att * w1a_ref[...] + b1_ref[...]     # f32 VPU (rank-1 update + bias)
    h = jnp.maximum(h, 0.0)                      # relu1

    # fc2
    h = jnp.dot(h.astype(jnp.bfloat16), w2_ref[...],
                preferred_element_type=jnp.float32) + b2_ref[...]
    h = jnp.maximum(h, 0.0)                      # relu2

    # fc3
    out_ref[...] = (jnp.dot(h.astype(jnp.bfloat16), w3_ref[...],
                            preferred_element_type=jnp.float32)
                    + b3_ref[...]).astype(out_ref.dtype)


# --------------------------------------------------------------------------- tiling

def _num_tensorcores():
    """Best-effort TensorCore count per chip (1 on v5e/v6e, 2 on v7x)."""
    try:
        info = pltpu.get_tpu_info()
        for attr in ("num_cores", "cores_per_chip", "num_tensorcores"):
            v = getattr(info, attr, None)
            if isinstance(v, int) and v > 0:
                return v
    except Exception:
        pass
    try:
        v = getattr(jax.devices()[0], "num_cores", None)
        if isinstance(v, int) and v > 0:
            return v
    except Exception:
        pass
    return 1


def _round_up(x, m):
    return ((x + m - 1) // m) * m


def _pick_tile_m(M, num_cores, *, cap=2048, min_rows=512):
    """Row tile for the grid.

    * 1 TensorCore (v5e/v6e): the grid is a serial loop, so use one full-array step
      whenever M <= cap (avoids the ~0.35 us per-step overhead); otherwise use the
      smallest number of ~cap-sized steps.
    * >1 TensorCore (v7x): target >= 2 steps per core so each core's pipeline can
      overlap DMA and compute, but keep steps >= min_rows so HBM time per step still
      dwarfs the per-step overhead.
    Returned tile is either == M (full-array block, always layout-legal) or a
    multiple of 16 (sublane-legal for f32 and packed bf16); M is padded by the caller.
    """
    if num_cores <= 1:
        if M <= cap:
            return M
        steps = pl.cdiv(M, cap)
        return min(cap, _round_up(pl.cdiv(M, steps), 16))
    want_steps = 2 * num_cores
    t = pl.cdiv(M, want_steps)
    t = min(cap, max(min_rows, t))
    t = _round_up(t, 16)
    if t >= M:
        return M
    return t


# --------------------------------------------------------------------------- wrapper

@functools.partial(jax.jit, static_argnames=("tile_m", "out_dtype"))
def _cdecoder_forward_jit(z2, att2, params, *, tile_m, out_dtype):
    M, L = z2.shape
    w1z, w1a, b1, w2, b2, w3, b3 = params
    F = w3.shape[1]

    # Keep the output store lane-dense: pad F to a multiple of 128 (no-op for 256).
    Fp = _round_up(F, 128)
    if Fp != F:
        w3 = jnp.pad(w3, ((0, 0), (0, Fp - F)))
        b3 = jnp.pad(b3, ((0, 0), (0, Fp - F)))

    # Pad rows so tile_m always divides the row count (awkward M handled by padding,
    # not by one giant tile).
    Mp = _round_up(M, tile_m)
    if Mp != M:
        z2 = jnp.pad(z2, ((0, Mp - M), (0, 0)))
        att2 = jnp.pad(att2, ((0, Mp - M), (0, 0)))

    grid = (Mp // tile_m,)
    full = lambda i: (0, 0)

    out = pl.pallas_call(
        _cdecoder_kernel,
        out_shape=jax.ShapeDtypeStruct((Mp, Fp), out_dtype),
        grid_spec=pltpu.PrefetchScalarGridSpec(
            num_scalar_prefetch=0,
            grid=grid,
            in_specs=[
                pl.BlockSpec((tile_m, L), lambda i: (i, 0)),   # z   (bf16 or f32)
                pl.BlockSpec((tile_m, 1), lambda i: (i, 0)),   # att (f32)
                pl.BlockSpec((L, L), full),                    # W1z  (in, out) bf16
                pl.BlockSpec((1, L), full),                    # w1 att row (f32)
                pl.BlockSpec((1, L), full),                    # b1 (f32)
                pl.BlockSpec((L, L), full),                    # W2   (in, out) bf16
                pl.BlockSpec((1, L), full),                    # b2 (f32)
                pl.BlockSpec((L, Fp), full),                   # W3   (in, out) bf16
                pl.BlockSpec((1, Fp), full),                   # b3 (f32)
            ],
            out_specs=pl.BlockSpec((tile_m, Fp), lambda i: (i, 0)),
        ),
        compiler_params=pltpu.CompilerParams(
            dimension_semantics=("parallel",),
            vmem_limit_bytes=32 * 1024 * 1024,   # explicit; tiles budgeted well below this
        ),
    )(z2, att2, w1z, w1a, b1, w2, b2, w3, b3)

    if Mp != M:
        out = out[:M]
    if Fp != F:
        out = out[:, :F]
    return out


def cdecoder_forward(z, att, params, *, tile_m=None, out_dtype=jnp.bfloat16):
    """z: (B, S, L) f32 or bf16; att: (B*S,) or (B, S). Returns (B, S, F)."""
    B, S, L = z.shape
    assert L == LATENT_SIZE
    M = B * S
    att = jnp.asarray(att)
    assert att.size == M, "att must hold exactly B*NUM_SEGMENTS scalars (row-major)"

    z2 = z.reshape(M, L)                                 # no dtype change (no extra HBM pass)
    att2 = att.reshape(M, 1).astype(jnp.float32)         # mirrors att.view(-1, S, 1)

    if tile_m is None:
        tile_m = _pick_tile_m(M, _num_tensorcores())

    out = _cdecoder_forward_jit(z2, att2, params, tile_m=tile_m, out_dtype=out_dtype)
    return out.reshape(B, S, -1)


# --------------------------------------------------------------------------- params / reference

def init_params(key, feature_dim=FEATURE_DIM):
    """Deterministic init matching nn.Linear shapes.

    Torch stores Linear weight as (out, in); we pre-transpose to (in, out), split fc1's
    (L+1, L) into a (L, L) z-block (bf16, MXU) and a (1, L) att row (f32, VPU), and keep
    the matmul weights in bf16 while biases stay f32.
    """
    ks = jax.random.split(key, 6)

    def lin(kw, kb, fan_in, fan_out):
        bound = 1.0 / jnp.sqrt(fan_in)
        w = jax.random.uniform(kw, (fan_out, fan_in), jnp.float32, -bound, bound)
        b = jax.random.uniform(kb, (1, fan_out), jnp.float32, -bound, bound)
        return w, b

    w1, b1 = lin(ks[0], ks[1], LATENT_SIZE + 1, LATENT_SIZE)   # (128, 129)
    w2, b2 = lin(ks[2], ks[3], LATENT_SIZE, LATENT_SIZE)       # (128, 128)
    w3, b3 = lin(ks[4], ks[5], LATENT_SIZE, feature_dim)       # (F, 128)

    w1z = w1[:, :LATENT_SIZE].T.astype(jnp.bfloat16)           # (128, 128) in x out
    w1a = w1[:, LATENT_SIZE:].T                                # (1, 128)   f32
    w2t = w2.T.astype(jnp.bfloat16)                            # (128, 128)
    w3t = w3.T.astype(jnp.bfloat16)                            # (128, F)
    return (w1z, w1a, b1, w2t, b2, w3t, b3)


def reference_forward(z, att, params):
    """Pure-JAX f32 replica of the PyTorch forward (explicit concat), using the same
    bf16-rounded weights as the kernel so only activation rounding differs."""
    w1z, w1a, b1, w2, b2, w3, b3 = [jnp.asarray(p, jnp.float32) for p in params]
    B, S, L = z.shape
    zf = z.astype(jnp.float32).reshape(-1, L)
    a = jnp.asarray(att).reshape(-1, 1).astype(jnp.float32)
    x = jnp.concatenate([zf, a], axis=-1)                 # torch.cat([z, att], -1)
    w1 = jnp.concatenate([w1z, w1a], axis=0)              # (L+1, L)
    x = jnp.maximum(x @ w1 + b1, 0.0)
    x = jnp.maximum(x @ w2 + b2, 0.0)
    x = x @ w3 + b3
    return x.reshape(B, S, -1)


def _check(out, ref, tag):
    err = float(jnp.max(jnp.abs(out.astype(jnp.float32) - ref)))
    scale = float(jnp.max(jnp.abs(ref)))
    assert err <= 0.03 * scale + 5e-2, f"{tag}: max abs err {err} (scale {scale})"


# --------------------------------------------------------------------------- demo

if __name__ == "__main__":
    key = jax.random.PRNGKey(0)
    kz, ka, kp, kz2, ka2, kz3, ka3 = jax.random.split(key, 7)

    params = init_params(kp)

    # Small shape matching the module: B=2, S=NUM_SEGMENTS=8, L=128 -> M=16 rows.
    B, S, L = 2, NUM_SEGMENTS, LATENT_SIZE
    z = jax.random.normal(kz, (B, S, L), jnp.float32)
    att = jax.random.uniform(ka, (B * S,), jnp.float32)
    out = jax.block_until_ready(cdecoder_forward(z, att, params, out_dtype=jnp.float32))
    assert out.shape == (B, S, FEATURE_DIM)
    _check(out, reference_forward(z, att, params), "small/f32")

    # Larger batch, bf16 producer + bf16 output (HBM-byte-optimized path).
    B2 = 256                                       # M = 2048
    z_big = jax.random.normal(kz2, (B2, S, L), jnp.float32).astype(jnp.bfloat16)
    att_big = jax.random.uniform(ka2, (B2 * S,), jnp.float32)
    out_big = jax.block_until_ready(cdecoder_forward(z_big, att_big, params))
    assert out_big.shape == (B2, S, FEATURE_DIM)
    _check(out_big, reference_forward(z_big, att_big, params), "big/bf16")

    # Awkward row count: exercises the row-padding + multi-step path.
    B3 = 300                                       # M = 2400 -> padded/tiled internally
    z_odd = jax.random.normal(kz3, (B3, S, L), jnp.float32).astype(jnp.bfloat16)
    att_odd = jax.random.uniform(ka3, (B3 * S,), jnp.float32)
    out_odd = jax.block_until_ready(cdecoder_forward(z_odd, att_odd, params))
    assert out_odd.shape == (B3, S, FEATURE_DIM)
    _check(out_odd, reference_forward(z_odd, att_odd, params), "odd/bf16")

    print("KERNEL_OK")
</pallas_src>

<mosaic_0001>
module attributes {stable_mosaic.version = 11 : i64} {
  func.func @_cdecoder_kernel(%arg0: i32, %arg1: memref<16x128xf32, #tpu.memory_space<vmem>>, %arg2: memref<16x1xf32, #tpu.memory_space<vmem>>, %arg3: memref<128x128xbf16, #tpu.memory_space<vmem>>, %arg4: memref<1x128xf32, #tpu.memory_space<vmem>>, %arg5: memref<1x128xf32, #tpu.memory_space<vmem>>, %arg6: memref<128x128xbf16, #tpu.memory_space<vmem>>, %arg7: memref<1x128xf32, #tpu.memory_space<vmem>>, %arg8: memref<128x256xbf16, #tpu.memory_space<vmem>>, %arg9: memref<1x256xf32, #tpu.memory_space<vmem>>, %arg10: memref<16x256xf32, #tpu.memory_space<vmem>>) attributes {dimension_semantics = [#tpu.dimension_semantics<parallel>], iteration_bounds = array<i64: 1>, scalar_prefetch = 0 : i64, scratch_operands = 0 : i64, tpu.core_type = #tpu.core_type<tc>, window_params = [{transform_indices = @transform_0, window_bounds = array<i64: 16, 128>}, {transform_indices = @transform_1, window_bounds = array<i64: 16, 1>}, {pipeline_mode = #tpu.pipeline_mode<synchronous>, transform_indices = @transform_2, window_bounds = array<i64: 128, 128>}, {pipeline_mode = #tpu.pipeline_mode<synchronous>, transform_indices = @transform_3, window_bounds = array<i64: 1, 128>}, {pipeline_mode = #tpu.pipeline_mode<synchronous>, transform_indices = @transform_4, window_bounds = array<i64: 1, 128>}, {pipeline_mode = #tpu.pipeline_mode<synchronous>, transform_indices = @transform_5, window_bounds = array<i64: 128, 128>}, {pipeline_mode = #tpu.pipeline_mode<synchronous>, transform_indices = @transform_6, window_bounds = array<i64: 1, 128>}, {pipeline_mode = #tpu.pipeline_mode<synchronous>, transform_indices = @transform_7, window_bounds = array<i64: 128, 256>}, {pipeline_mode = #tpu.pipeline_mode<synchronous>, transform_indices = @transform_8, window_bounds = array<i64: 1, 256>}, {transform_indices = @transform_9, window_bounds = array<i64: 16, 256>}]} {
    %c0 = arith.constant 0 : index
    %c0_0 = arith.constant 0 : index
    %0 = vector.load %arg1[%c0, %c0_0] : memref<16x128xf32, #tpu.memory_space<vmem>>, vector<16x128xf32>
    %1 = arith.truncf %0 : vector<16x128xf32> to vector<16x128xbf16>
    %c0_1 = arith.constant 0 : index
    %c0_2 = arith.constant 0 : index
    %2 = vector.load %arg2[%c0_1, %c0_2] : memref<16x1xf32, #tpu.memory_space<vmem>>, vector<16x1xf32>
    %c0_3 = arith.constant 0 : index
    %c0_4 = arith.constant 0 : index
    %3 = vector.load %arg3[%c0_3, %c0_4] : memref<128x128xbf16, #tpu.memory_space<vmem>>, vector<128x128xbf16>
    %cst = arith.constant dense<0.000000e+00> : vector<16x128xf32>
    %4 = tpu.matmul %1, %3, %cst {dimension_numbers = #tpu.dot_dimension_numbers<[1], [0], [0], [1], [0, 0, 1, 1], [], []>} : vector<16x128xbf16>, vector<128x128xbf16>, vector<16x128xf32> -> vector<16x128xf32>
    %c0_5 = arith.constant 0 : index
    %c0_6 = arith.constant 0 : index
    %5 = vector.load %arg4[%c0_5, %c0_6] : memref<1x128xf32, #tpu.memory_space<vmem>>, vector<1x128xf32>
    %6 = vector.broadcast %2 : vector<16x1xf32> to vector<16x128xf32>
    %7 = vector.broadcast %5 : vector<1x128xf32> to vector<16x128xf32>
    %8 = arith.mulf %6, %7 : vector<16x128xf32>
    %9 = arith.addf %4, %8 : vector<16x128xf32>
    %c0_7 = arith.constant 0 : index
    %c0_8 = arith.constant 0 : index
    %10 = vector.load %arg5[%c0_7, %c0_8] : memref<1x128xf32, #tpu.memory_space<vmem>>, vector<1x128xf32>
    %11 = vector.broadcast %10 : vector<1x128xf32> to vector<16x128xf32>
    %12 = arith.addf %9, %11 : vector<16x128xf32>
    %cst_9 = arith.constant 0.000000e+00 : f32
    %13 = vector.broadcast %cst_9 : f32 to vector<16x128xf32>
    %14 = arith.maximumf %12, %13 : vector<16x128xf32>
    %15 = arith.truncf %14 : vector<16x128xf32> to vector<16x128xbf16>
    %c0_10 = arith.constant 0 : index
    %c0_11 = arith.constant 0 : index
    %16 = vector.load %arg6[%c0_10, %c0_11] : memref<128x128xbf16, #tpu.memory_space<vmem>>, vector<128x128xbf16>
    %cst_12 = arith.constant dense<0.000000e+00> : vector<16x128xf32>
    %17 = tpu.matmul %15, %16, %cst_12 {dimension_numbers = #tpu.dot_dimension_numbers<[1], [0], [0], [1], [0, 0, 1, 1], [], []>} : vector<16x128xbf16>, vector<128x128xbf16>, vector<16x128xf32> -> vector<16x128xf32>
    %c0_13 = arith.constant 0 : index
    %c0_14 = arith.constant 0 : index
    %18 = vector.load %arg7[%c0_13, %c0_14] : memref<1x128xf32, #tpu.memory_space<vmem>>, vector<1x128xf32>
    %19 = vector.broadcast %18 : vector<1x128xf32> to vector<16x128xf32>
    %20 = arith.addf %17, %19 : vector<16x128xf32>
    %cst_15 = arith.constant 0.000000e+00 : f32
    %21 = vector.broadcast %cst_15 : f32 to vector<16x128xf32>
    %22 = arith.maximumf %20, %21 : vector<16x128xf32>
    %23 = arith.truncf %22 : vector<16x128xf32> to vector<16x128xbf16>
    %c0_16 = arith.constant 0 : index
    %c0_17 = arith.constant 0 : index
    %24 = vector.load %arg8[%c0_16, %c0_17] : memref<128x256xbf16, #tpu.memory_space<vmem>>, vector<128x256xbf16>
    %cst_18 = arith.constant dense<0.000000e+00> : vector<16x256xf32>
    %25 = tpu.matmul %23, %24, %cst_18 {dimension_numbers = #tpu.dot_dimension_numbers<[1], [0], [0], [1], [0, 0, 1, 1], [], []>} : vector<16x128xbf16>, vector<128x256xbf16>, vector<16x256xf32> -> vector<16x256xf32>
    %c0_19 = arith.constant 0 : index
    %c0_20 = arith.constant 0 : index
    %26 = vector.load %arg9[%c0_19, %c0_20] : memref<1x256xf32, #tpu.memory_space<vmem>>, vector<1x256xf32>
    %27 = vector.broadcast %26 : vector<1x256xf32> to vector<16x256xf32>
    %28 = arith.addf %25, %27 : vector<16x256xf32>
    %c0_21 = arith.constant 0 : index
    %c0_22 = arith.constant 0 : index
    %29 = vector.load %arg10[%c0_21, %c0_22] : memref<16x256xf32, #tpu.memory_space<vmem>>, vector<16x256xf32>
    tpu.vector_store %arg10[%c0_21, %c0_22], %28 {strides = array<i32>} : memref<16x256xf32, #tpu.memory_space<vmem>>, vector<16x256xf32>,
    return
  }
  func.func @transform_0(%arg0: i32) -> (i32, i32) {
    %c0_i32 = arith.constant 0 : i32
    %c0_i32_0 = arith.constant 0 : i32
    return %arg0, %c0_i32 : i32, i32
  }
  func.func @transform_1(%arg0: i32) -> (i32, i32) {
    %c0_i32 = arith.constant 0 : i32
    %c0_i32_0 = arith.constant 0 : i32
    return %arg0, %c0_i32 : i32, i32
  }
  func.func @transform_2(%arg0: i32) -> (i32, i32) {
    %c0_i32 = arith.constant 0 : i32
    %c0_i32_0 = arith.constant 0 : i32
    %c0_i32_1 = arith.constant 0 : i32
    return %c0_i32, %c0_i32_0 : i32, i32
  }
  func.func @transform_3(%arg0: i32) -> (i32, i32) {
    %c0_i32 = arith.constant 0 : i32
    %c0_i32_0 = arith.constant 0 : i32
    %c0_i32_1 = arith.constant 0 : i32
    return %c0_i32, %c0_i32_0 : i32, i32
  }
  func.func @transform_4(%arg0: i32) -> (i32, i32) {
    %c0_i32 = arith.constant 0 : i32
    %c0_i32_0 = arith.constant 0 : i32
    %c0_i32_1 = arith.constant 0 : i32
    return %c0_i32, %c0_i32_0 : i32, i32
  }
  func.func @transform_5(%arg0: i32) -> (i32, i32) {
    %c0_i32 = arith.constant 0 : i32
    %c0_i32_0 = arith.constant 0 : i32
    %c0_i32_1 = arith.constant 0 : i32
    return %c0_i32, %c0_i32_0 : i32, i32
  }
  func.func @transform_6(%arg0: i32) -> (i32, i32) {
    %c0_i32 = arith.constant 0 : i32
    %c0_i32_0 = arith.constant 0 : i32
    %c0_i32_1 = arith.constant 0 : i32
    return %c0_i32, %c0_i32_0 : i32, i32
  }
  func.func @transform_7(%arg0: i32) -> (i32, i32) {
    %c0_i32 = arith.constant 0 : i32
    %c0_i32_0 = arith.constant 0 : i32
    %c0_i32_1 = arith.constant 0 : i32
    return %c0_i32, %c0_i32_0 : i32, i32
  }
  func.func @transform_8(%arg0: i32) -> (i32, i32) {
    %c0_i32 = arith.constant 0 : i32
    %c0_i32_0 = arith.constant 0 : i32
    %c0_i32_1 = arith.constant 0 : i32
    return %c0_i32, %c0_i32_0 : i32, i32
  }
  func.func @transform_9(%arg0: i32) -> (i32, i32) {
    %c0_i32 = arith.constant 0 : i32
    %c0_i32_0 = arith.constant 0 : i32
    return %arg0, %c0_i32 : i32, i32
  }
}

</mosaic_0001>

<bundles_post_ra>
// kernel: _cdecoder_forward_jit.1
= control target key start
LH: loop header
LB: loop body
LE: loop exit
PB: predicated region body
PF: predicated region fallthrough
CT: control target
= control target key end

     0   :  { %14 = vsyncpa [#allocation3], 0  ;;  %s887_s0 = inlined_call_operand.vmem [shape: f32[16,128], index: 0, kind: input, shape index: {}]   ;;  %s888_s1 = inlined_call_operand.vmem [shape: f32[16,1], index: 1, kind: input, shape index: {}]   ;;  %s889_s2 = inlined_call_operand.hbm [shape: bf16[128,128], index: 2, kind: input, shape index: {}]   ;;  %s890_s3 = inlined_call_operand.vmem [shape: f32[1,128], index: 3, kind: input, shape index: {}]   ;;  %s891_s4 = inlined_call_operand.vmem [shape: f32[1,128], index: 4, kind: input, shape index: {}]   ;;  %s892_s5 = inlined_call_operand.hbm [shape: bf16[128,128], index: 5, kind: input, shape index: {}]   ;;  %s893_s6 = inlined_call_operand.vmem [shape: f32[1,128], index: 6, kind: input, shape index: {}]   ;;  %s894_s7 = inlined_call_operand.hbm [shape: bf16[128,256], index: 7, kind: input, shape index: {}]   ;;  %s895_s8 = inlined_call_operand.vmem [shape: f32[1,256], index: 8, kind: input, shape index: {}]   ;;  %s896_s9 = inlined_call_operand.hbm [shape: f32[16,256], index: 9, kind: output, shape index: {}]  }
   0x1   :  { %15 = vsyncpa [#allocation6], 0 }
   0x2   :  { %16 = vsyncpa [#allocation4], 0  ;;  %s745_s30 = smov [#allocation5]   ;;  %s746_s11 = smov [#allocation2]  }
   0x3   :  { %s42_s10 = sshll.u32 %s745_s30, 4  ;;  %s26_s12 = sshll.u32 %s746_s11, 4  ;;  %s43_s10 = int_to_ptr.vmem [resolvable:$true] %s42_s10  ;;  %s808_s12 = int_to_ptr.vmem [resolvable:$true] %s26_s12 }
   0x4   :  { %s651_s15 = scalar_lea.hbm %s892_s5, 1024 }
   0x5   :  { %p652_p0 = scmp.ne.s32.totalorder %s892_s5, %s651_s15  ;;  %p655_p1 = scmp.lt.u32.totalorder %s651_s15, %s892_s5 }
   0x7   :  { %p657_p2 = pnand %p655_p1, %p652_p0 }
   0x9   :  { %660 = shalt.err (!%p657_p2)
}
   0xa   :  { %s661_s20 = scalar_lea.vmem %s43_s10, 1024  ;;  %p666_p4 = scmp.lt.s32.totalorder %s43_s10, %s43_s10 }
   0xb   :  { %p662_p3 = scmp.ne.s32.totalorder %s43_s10, %s661_s20  ;;  %p667_p5 = scmp.lt.s32.totalorder %s661_s20, %s661_s20 }
   0xd   :  { %p668_p6 = por %p667_p5, %p666_p4 }
   0xf   :  { %p669_p7 = pnand %p668_p6, %p662_p3 }
  0x11   :  { %672 = shalt.err (!%p669_p7)
}
  0x12   :  { %s747_s21 = smov 64   ;;  %s748_s22 = smov 4  }
  0x13   :  { %48 = dma.hbm_to_vmem [thread:$0]  %s892_s5, 1024, %s43_s10, [#allocation6], %s747_s21, %s747_s21, %s748_s22  }
  0x14   :  { %s673_s27 = scalar_lea.hbm %s889_s2, 1024 }
  0x15   :  { %p674_p8 = scmp.ne.s32.totalorder %s889_s2, %s673_s27  ;;  %p677_p9 = scmp.lt.u32.totalorder %s673_s27, %s889_s2 }
  0x17   :  { %p679_p10 = pnand %p677_p9, %p674_p8 }
  0x19   :  { %682 = shalt.err (!%p679_p10)
}
  0x1a   :  { %s683_s13 = scalar_lea.vmem %s808_s12, 1024  ;;  %p688_p12 = scmp.lt.s32.totalorder %s808_s12, %s808_s12 }
  0x1b   :  { %p684_p11 = scmp.ne.s32.totalorder %s808_s12, %s683_s13  ;;  %p689_p13 = scmp.lt.s32.totalorder %s683_s13, %s683_s13 }
  0x1d   :  { %p690_p0 = por %p689_p13, %p688_p12 }
  0x1f   :  { %p691_p1 = pnand %p690_p0, %p684_p11 }
  0x21   :  { %694 = shalt.err (!%p691_p1)
}
  0x22   :  { %32 = dma.hbm_to_vmem [thread:$0]  %s889_s2, 1024, %s808_s12, [#allocation3], %s747_s21, %s747_s21, %s748_s22  }
  0x23   :  { %s749_s14 = smov [#allocation7]   ;;  %s695_s18 = scalar_lea.hbm %s894_s7, 2048 }
  0x24   :  { %s56_s15 = sshll.u32 %s749_s14, 4  ;;  %p696_p2 = scmp.ne.s32.totalorder %s894_s7, %s695_s18  ;;  %s57_s15 = int_to_ptr.vmem [resolvable:$true] %s56_s15 }
  0x25   :  { %p699_p3 = scmp.lt.u32.totalorder %s695_s18, %s894_s7 }
  0x27   :  { %p701_p4 = pnand %p699_p3, %p696_p2 }
  0x29   :  { %704 = shalt.err (!%p701_p4)
}
  0x2a   :  { %s705_s25 = scalar_lea.vmem %s57_s15, 2048  ;;  %p710_p6 = scmp.lt.s32.totalorder %s57_s15, %s57_s15 }
  0x2b   :  { %p706_p5 = scmp.ne.s32.totalorder %s57_s15, %s705_s25  ;;  %p711_p7 = scmp.lt.s32.totalorder %s705_s25, %s705_s25 }
  0x2d   :  { %p712_p8 = por %p711_p7, %p710_p6 }
  0x2f   :  { %p713_p9 = pnand %p712_p8, %p706_p5 }
  0x31   :  { %716 = shalt.err (!%p713_p9)
}
  0x32   :  { %s750_s2 = smov 128   ;;  %s751_s12 = smov 8  }
  0x33   :  { %62 = dma.hbm_to_vmem [thread:$0]  %s894_s7, 2048, %s57_s15, [#allocation6], %s750_s2, %s750_s2, %s751_s12  }
  0x34   :  { %739 = dma.done.wait [#allocation3], 1024  }
  0x35   :  { %740 = vsyncadd [#allocation3], 4294966272 }
  0x36   :  { %741 = dma.done.wait [#allocation6], 3072  }
  0x37   :  { %742 = vsyncadd [#allocation6], 4294964224  ;;  %v752_v0 = vmov 0.0   ;;  %vm753_vm0 = vmmov 0   ;;  %v754_v1 = vmov 0   ;;  %v611_v2 = vld [vmem:[#allocation2] sm:$0xff]  }
  0x38   :  { %557 = vmatprep.subr.bf16.mxu0 %v752_v0  ;;  %573 = vmatprep.mubr.msk.bf16.mxu0 %vm753_vm0, %v752_v0  ;;  %v612_v3 = vld [vmem:[#allocation2 + $0x8] sm:$0xff]   ;;  %v613_v4 = vld [vmem:[#allocation2 + $0x10] sm:$0xff]   ;;  %v614_v5 = vld [vmem:[#allocation2 + $0x18] sm:$0xff]  }
  0x39   :  { %610 = vset.pattern.permute.xlu0 %v754_v1  ;;  %577 = vmatprep.subr.bf16.mxu1 %v752_v0  ;;  %v78_v6 = vld [vmem:[%s888_s1] sm:$0xff]  ;;  %v79_v7 = vld [vmem:[%s888_s1 + $0x8] sm:$0xff]  ;;  %v621_v11 = vld [vmem:[#allocation5 + $0x10] sm:$0xff]  }
  0x3a   :  { %593 = vmatprep.mubr.msk.bf16.mxu1 %vm753_vm0, %v752_v0  ;;  %558 = vmatpush3.bf16.msra.mxu0 %v611_v2  ;;  %v619_v8 = vld [vmem:[#allocation5] sm:$0xff]   ;;  %v620_v9 = vld [vmem:[#allocation5 + $0x8] sm:$0xff]   ;;  %v622_v13 = vld [vmem:[#allocation5 + $0x18] sm:$0xff]   ;;  %v349_v2 = vlaneseq }
  0x3b   :  { %559 = vmatprep.subr.bf16.mxu0 %v752_v0  ;;  %99 = vperm.xlu0 %610, %v78_v6   ;;  %v615_v10 = vld [vmem:[#allocation2 + $0x20] sm:$0xff]   ;;  %v616_v12 = vld [vmem:[#allocation2 + $0x28] sm:$0xff]   ;;  %v617_v14 = vld [vmem:[#allocation2 + $0x30] sm:$0xff]  }
  0x3c   :  { %578 = vmatpush3.bf16.msra.mxu1 %v619_v8  ;;  %v623_v15 = vld [vmem:[#allocation5 + $0x20] sm:$0xff]   ;;  %v618_v16 = vld [vmem:[#allocation2 + $0x38] sm:$0xff]   ;;  %v76_v18 = vld [vmem:[%s887_s0 + $0x8] sm:$0xff] }
  0x3d   :  { %579 = vmatprep.subr.bf16.mxu1 %v752_v0  ;;  %v75_v17 = vld [vmem:[%s887_s0] sm:$0xff]  ;;  %v624_v20 = vld [vmem:[#allocation5 + $0x28] sm:$0xff]   ;;  %v625_v21 = vld [vmem:[#allocation5 + $0x30] sm:$0xff]  }
  0x3e   :  { %560 = vmatpush3.bf16.msra.mxu0 %v612_v3  ;;  %v77_v19 = vpack.c.bf16 %v76_v18, %v75_v17  ;;  %v626_v22 = vld [vmem:[#allocation5 + $0x38] sm:$0xff]   ;;  %v627_v23 = vld [vmem:[#allocation7] ss:$8 sps:$4 sm:$0xff]   ;;  %v629_v24 = vld [vmem:[#allocation7 + $0x4] ss:$8 sps:$4 sm:$0xff]   ;;  %v350_v3 = vshrl.u32 %v349_v2, 7 }
  0x3f   :  { %561 = vmatprep.subr.bf16.mxu0 %v752_v0  ;;  %104 = vperm.xlu0 %610, %v79_v7   ;;  %v632_v25 = vld [vmem:[#allocation7 + $0x14] ss:$8 sps:$4 sm:$0xff]   ;;  %v630_v26 = vld [vmem:[#allocation7 + $0x10] ss:$8 sps:$4 sm:$0xff]   ;;  %v635_v27 = vld [vmem:[#allocation7 + $0x24] ss:$8 sps:$4 sm:$0xff]  }
  0x40   :  { %580 = vmatpush3.bf16.msra.mxu1 %v620_v9  ;;  %v633_v28 = vld [vmem:[#allocation7 + $0x20] ss:$8 sps:$4 sm:$0xff]   ;;  %v638_v29 = vld [vmem:[#allocation7 + $0x34] ss:$8 sps:$4 sm:$0xff]   ;;  %v636_v30 = vld [vmem:[#allocation7 + $0x30] ss:$8 sps:$4 sm:$0xff]  }
  0x41   :  { %581 = vmatprep.subr.bf16.mxu1 %v752_v0  ;;  %v641_v31 = vld [vmem:[#allocation7 + $0x44] ss:$8 sps:$4 sm:$0xff]   ;;  %v639_v32 = vld [vmem:[#allocation7 + $0x40] ss:$8 sps:$4 sm:$0xff]   ;;  %v644_v33 = vld [vmem:[#allocation7 + $0x54] ss:$8 sps:$4 sm:$0xff]  }
  0x42   :  { %562 = vmatpush3.bf16.msra.mxu0 %v613_v4  ;;  %v642_v34 = vld [vmem:[#allocation7 + $0x50] ss:$8 sps:$4 sm:$0xff]   ;;  %v504_v36 = vld [vmem:[%s890_s3] ss:$0 sm:$0xff]  ;;  %v647_v52 = vld [vmem:[#allocation7 + $0x64] ss:$8 sps:$4 sm:$0xff]  }
  0x43   :  { %563 = vmatprep.subr.bf16.mxu0 %v752_v0  ;;  %v513_v40 = vld [vmem:[%s891_s4] ss:$0 sm:$0xff]  ;;  %v650_v54 = vld [vmem:[#allocation7 + $0x74] ss:$8 sps:$4 sm:$0xff]   ;;  %v648_v55 = vld [vmem:[#allocation7 + $0x70] ss:$8 sps:$4 sm:$0xff]  }
  0x44   :  { %582 = vmatpush3.bf16.msra.mxu1 %v621_v11  ;;  %v645_v53 = vld [vmem:[#allocation7 + $0x60] ss:$8 sps:$4 sm:$0xff]   ;;  %v351_v4 = vsub.s32 0, %v350_v3  ;;  %v355_v6 = vsub.s32 1, %v350_v3 }
  0x45   :  { %583 = vmatprep.subr.bf16.mxu1 %v752_v0  ;;  %v514_v56 = vld [vmem:[%s893_s6] ss:$0 sm:$0xff]  ;;  %s755_s6 = smov [#allocation8]  }
  0x46   :  { %564 = vmatpush3.bf16.msra.mxu0 %v614_v5  ;;  %v347_v5 = vld [vmem:[%s895_s8] sm:$0x3]  ;;  %s491_s16 = sshll.u32 %s755_s6, 4  ;;  %s492_s16 = int_to_ptr.vmem [resolvable:$true] %s491_s16 }
  0x47   :  { %565 = vmatprep.subr.bf16.mxu0 %v752_v0  ;;  %v352_v7 = vrot.slane %v347_v5, %v351_v4  ;;  %v356_v8 = vrot.slane %v347_v5, %v355_v6  ;;  %s717_s17 = scalar_lea.vmem %s492_s16, 512  ;;  %p722_p11 = scmp.lt.s32.totalorder %s492_s16, %s492_s16 }
  0x48   :  { %584 = vmatpush3.bf16.msra.mxu1 %v622_v13  ;;  %p718_p10 = scmp.ne.s32.totalorder %s492_s16, %s717_s17  ;;  %p723_p12 = scmp.lt.s32.totalorder %s717_s17, %s717_s17 }
  0x49   :  { %585 = vmatprep.subr.bf16.mxu1 %v752_v0 }
  0x4a   :  { %566 = vmatpush3.bf16.msra.mxu0 %v615_v10  ;;  %p724_p13 = por %p723_p12, %p722_p11 }
  0x4b   :  { %567 = vmatprep.subr.bf16.mxu0 %v752_v0 }
  0x4c   :  { %586 = vmatpush3.bf16.msra.mxu1 %v623_v15  ;;  %p725_p0 = pnand %p724_p13, %p718_p10 }
  0x4d   :  { %587 = vmatprep.subr.bf16.mxu1 %v752_v0 }
  0x4e   :  { %568 = vmatpush3.bf16.msra.mxu0 %v616_v12 }
  0x4f   :  { %569 = vmatprep.subr.bf16.mxu0 %v752_v0 }
  0x50   :  { %588 = vmatpush3.bf16.msra.mxu1 %v624_v20 }
  0x51   :  { %589 = vmatprep.subr.bf16.mxu1 %v752_v0 }
  0x52   :  { %570 = vmatpush3.bf16.msra.mxu0 %v617_v14 }
  0x53   :  { %571 = vmatprep.subr.bf16.mxu0 %v752_v0 }
  0x54   :  { %590 = vmatpush3.bf16.msra.mxu1 %v625_v21 }
  0x55   :  { %591 = vmatprep.subr.bf16.mxu1 %v752_v0 }
  0x56   :  { %572 = vmatpush3.bf16.msra.mxu0 %v618_v16 }
  0x57   :  { %439 = vmatprep.subr.bf16.mxu0 %v629_v24 }
  0x58   :  { %592 = vmatpush3.bf16.msra.mxu1 %v626_v22 }
  0x59   :  { %574 = vmatmul.mubr.bf16.vlgmr.msra.gmra.mrb[0].mxu0 %v77_v19 }
  0x5a   :  { %471 = vmatprep.mubr.bf16.mxu0 %v754_v1  ;;  %440 = vmatpush1.bf16.msra.mxu0 %v627_v23 }
  0x5b   :  { %441 = vmatprep.subr.bf16.mxu0 %v632_v25 }
  0x5e   :  { %442 = vmatpush1.bf16.msra.mxu0 %v630_v26 }
  0x5f   :  { %443 = vmatprep.subr.bf16.mxu0 %v635_v27 }
  0x62   :  { %444 = vmatpush1.bf16.msra.mxu0 %v633_v28 }
  0x63   :  { %445 = vmatprep.subr.bf16.mxu0 %v638_v29 }
  0x66   :  { %446 = vmatpush1.bf16.msra.mxu0 %v636_v30 }
  0x67   :  { %447 = vmatprep.subr.bf16.mxu0 %v641_v31 }
  0x6a   :  { %448 = vmatpush1.bf16.msra.mxu0 %v639_v32 }
  0x6b   :  { %449 = vmatprep.subr.bf16.mxu0 %v644_v33 }
  0x6e   :  { %450 = vmatpush1.bf16.msra.mxu0 %v642_v34 }
  0x6f   :  { %451 = vmatprep.subr.bf16.mxu0 %v647_v52 }
  0x72   :  { %452 = vmatpush1.bf16.msra.mxu0 %v645_v53 }
  0x73   :  { %453 = vmatprep.subr.bf16.mxu0 %v650_v54 }
  0x76   :  { %454 = vmatpush1.bf16.msra.mxu0 %v648_v55 }
  0xba   :  { %v100_v35 = vpop.permute.xlu0 %99 }
  0xbb   :  { %v113_v38 = vmul.f32 %v504_v36, %v100_v35 }
  0xbe   :  { %v105_v37 = vpop.permute.xlu0 %104 }
  0xbf   :  { %v114_v41 = vmul.f32 %v504_v36, %v105_v37 }
 0x12c   :  { %v197_v39 = vpop.f32.mrb[0].mxu0 }
 0x12d   :  { %v198_v42 = vadd.f32 %v197_v39, %v113_v38  ;;  %v575_v43 = vpop.f32.mrb[1].mxu0 }
 0x12e   :  { %v200_v44 = vpop.f32.mrb[2].mxu0 }
 0x12f   :  { %v211_v45 = vadd.f32 %v513_v40, %v198_v42  ;;  %v201_v46 = vadd.f32 %v200_v44, %v114_v41  ;;  %v576_v47 = vpop.f32.mrb[3].mxu0 }
 0x131   :  { %v212_v48 = vadd.f32 %v513_v40, %v201_v46  ;;  %v213_v49 = vmax.f32 %v211_v45, 0.0 }
 0x133   :  { %v214_v50 = vmax.f32 %v212_v48, 0.0 }
 0x135   :  { %v215_v51 = vpack.c.bf16 %v214_v50, %v213_v49 }
 0x137   :  { %594 = vmatmul.mubr.bf16.vlgmr.msra.gmra.mrb[0].mxu1 %v215_v51 }
 0x20a   :  { %v321_v57 = vpop.f32.mrb[0].mxu1 }
 0x20b   :  { %v322_v58 = vadd.f32 %v514_v56, %v321_v57  ;;  %v595_v59 = vpop.f32.mrb[1].mxu1 }
 0x20c   :  { %v324_v60 = vpop.f32.mrb[2].mxu1 }
 0x20d   :  { %v325_v61 = vadd.f32 %v514_v56, %v324_v60  ;;  %v596_v62 = vpop.f32.mrb[3].mxu1  ;;  %v328_v63 = vmax.f32 %v322_v58, 0.0 }
 0x20f   :  { %v329_v0 = vmax.f32 %v325_v61, 0.0 }
 0x211   :  { %v330_v1 = vpack.c.bf16 %v329_v0, %v328_v63 }
 0x213   :  { %472 = vmatmul.mubr.bf16.vlgmr.msra.gmra.mrb[4].mxu0 %v330_v1 }
 0x2e6   :  { %v473_v9 = vpop.f32.mrb[4].mxu0 }
 0x2e7   :  { %v474_v10 = vadd.f32 %v473_v9, %v352_v7  ;;  %v475_v11 = vpop.f32.mrb[5].mxu0 }
 0x2e8   :  { %v476_v12 = vadd.f32 %v475_v11, %v356_v8  ;;  %v477_v13 = vpop.f32.mrb[6].mxu0 }
 0x2e9   :  { %482 = vst [vmem:[#allocation8] sm:$0xff] %v474_v10  ;;  %v478_v14 = vadd.f32 %v477_v13, %v352_v7  ;;  %v479_v15 = vpop.f32.mrb[7].mxu0 }
 0x2ea   :  { %483 = vst [vmem:[#allocation8 + $0x8] sm:$0xff] %v476_v12  ;;  %v480_v16 = vadd.f32 %v479_v15, %v356_v8 }
 0x2eb   :  { %484 = vst [vmem:[#allocation8 + $0x10] sm:$0xff] %v478_v14 }
 0x2ec   :  { %485 = vst [vmem:[#allocation8 + $0x18] sm:$0xff] %v480_v16 }
 0x2ed   :  { %728 = shalt.err (!%p725_p0)
}
 0x2ee   :  { %s729_s19 = scalar_lea.hbm %s896_s9, 512 }
 0x2ef   :  { %p730_p1 = scmp.ne.s32.totalorder %s896_s9, %s729_s19  ;;  %p733_p2 = scmp.lt.u32.totalorder %s729_s19, %s896_s9 }
 0x2f1   :  { %p735_p3 = pnand %p733_p2, %p730_p1 }
 0x2f3   :  { %738 = shalt.err (!%p735_p3)
}
 0x2f4   :  { %s756_s2 = smov 256   ;;  %s757_s12 = smov 16  }
 0x2f5   :  { %497 = dma.vmem_to_hbm [thread:$0]  %s492_s16, 512, %s896_s9, [#allocation4], %s756_s2, %s756_s2, %s757_s12  }
 0x2f6   :  { %743 = dma.done.wait [#allocation4], 512  }
 0x2f7   :  { %744 = vsyncadd [#allocation4], 4294966784 }
 0x2f8   :  { %501 = vsyncpa [#allocation3], 1 }
 0x2f9   :  { %502 = vsyncpa [#allocation6], 1 }
 0x2fa   :  { %503 = vsyncpa [#allocation4], 1 }

</bundles_post_ra>
